<compile_context>
chip_gen: v7x
topology: tpu7x:2x2x1
jax: 0.10.0
libtpu: 0.0.40
codegen_flags: <defaults>
</compile_context>

<pallas_src>
import jax
import jax.numpy as jnp
from jax.experimental import pallas as pl
from jax.experimental.pallas import tpu as pltpu

H1 = 512            # hidden 1
H2 = 256            # hidden 2
N_OUT_PAD = 128     # lane-dense padded width of the final (256 -> 1) layer
K_ALIGN = 512       # keep K a multiple of 512 -> full 128-wide MXU K passes
SINGLE_K_MAX = 4096  # keep w1 as a single resident block up to this K
TK_STREAM = 2048     # K tile when w1 has to be streamed from HBM


def _k_tiling(d_in):
    """Returns (k_pad, tk, num_k)."""
    k_pad = K_ALIGN * pl.cdiv(d_in, K_ALIGN)
    if k_pad <= SINGLE_K_MAX:
        return k_pad, k_pad, 1
    k_pad = TK_STREAM * pl.cdiv(d_in, TK_STREAM)
    return k_pad, TK_STREAM, k_pad // TK_STREAM


def _choose_tm(batch):
    """M tile: minimal padding for tiny batches, >=2 parallel tiles otherwise."""
    if batch <= 128:
        return 16 * pl.cdiv(max(batch, 1), 16)   # one tile, 16-row aligned (bf16)
    if batch <= 256:
        return 128                               # 2 M tiles -> both v7x TCs busy
    return 256                                   # more reuse per streamed w1 block


def _disc_kernel_single_k(x_ref, w1_ref, b1_ref, w2_ref, b2_ref, w3_ref, b3_ref,
                          o_ref):
    """Fast path: whole K in one block. Grid = (M tiles,). No scratch, no gates."""
    # Layer 1 (bf16 MXU, f32 accumulation) + bias + LeakyReLU(0.2) in f32.
    h = jnp.dot(x_ref[...], w1_ref[...], preferred_element_type=jnp.float32)
    h = h + b1_ref[...]
    h = jnp.where(h > 0, h, 0.2 * h)
    # Layer 2.
    h = jnp.dot(h.astype(w2_ref.dtype), w2_ref[...],
                preferred_element_type=jnp.float32)
    h = h + b2_ref[...]
    h = jnp.where(h > 0, h, 0.2 * h)
    # Layer 3 (lane-dense, real logit in column 0) + sigmoid.
    h = jnp.dot(h.astype(w3_ref.dtype), w3_ref[...],
                preferred_element_type=jnp.float32)
    h = h + b3_ref[...]
    o_ref[...] = jax.nn.sigmoid(h).astype(o_ref.dtype)


def _disc_kernel_k_tiled(x_ref, w1_ref, b1_ref, w2_ref, b2_ref, w3_ref, b3_ref,
                         o_ref, acc_ref):
    """Large-K path. Grid = (M tiles, K tiles); layer-1 accumulated in f32 VMEM."""
    k = pl.program_id(1)
    partial = jnp.dot(x_ref[...], w1_ref[...], preferred_element_type=jnp.float32)

    @pl.when(k == 0)
    def _():
        # Write-on-first-step (no zero store / read-modify-write), bias folded in.
        acc_ref[...] = partial + b1_ref[...]

    @pl.when(k > 0)
    def _():
        acc_ref[...] += partial

    @pl.when(k == pl.num_programs(1) - 1)
    def _():
        h = acc_ref[...]                                   # (tm, 512) f32, bias included
        h = jnp.where(h > 0, h, 0.2 * h)
        h = jnp.dot(h.astype(w2_ref.dtype), w2_ref[...],
                    preferred_element_type=jnp.float32)    # (tm, 256)
        h = h + b2_ref[...]
        h = jnp.where(h > 0, h, 0.2 * h)
        h = jnp.dot(h.astype(w3_ref.dtype), w3_ref[...],
                    preferred_element_type=jnp.float32)    # (tm, 128)
        h = h + b3_ref[...]
        o_ref[...] = jax.nn.sigmoid(h).astype(o_ref.dtype)


def prepare_params(params, d_in):
    """One-time weight padding / casting, hoisted off the per-call forward path."""
    w1, b1, w2, b2, w3, b3 = params
    k_pad, _, _ = _k_tiling(d_in)

    if k_pad == d_in:
        w1_p = w1.astype(jnp.bfloat16)
    else:
        w1_p = jnp.zeros((k_pad, H1), jnp.bfloat16)
        w1_p = w1_p.at[:d_in, :].set(w1.astype(jnp.bfloat16))

    # Lane-dense final layer: pad N from 1 -> 128 (real logit lives in column 0).
    w3_p = jnp.zeros((H2, N_OUT_PAD), jnp.bfloat16).at[:, :1].set(w3.astype(jnp.bfloat16))
    b3_p = jnp.zeros((1, N_OUT_PAD), jnp.float32).at[:, :1].set(b3.astype(jnp.float32))

    return (w1_p,
            b1.astype(jnp.float32).reshape(1, H1),
            w2.astype(jnp.bfloat16),
            b2.astype(jnp.float32).reshape(1, H2),
            w3_p, b3_p)


def discriminator_forward(img, prepared, batch_size, img_shape):
    """img: array with batch_size * img_shape[2]**3 elements (e.g. (B, W, W, W))."""
    d_in = img_shape[2] ** 3
    k_pad, tk, num_k = _k_tiling(d_in)
    tm = _choose_tm(batch_size)
    m_pad = tm * pl.cdiv(batch_size, tm)
    num_m = m_pad // tm

    w1_p, b1_f, w2_b, b2_f, w3_p, b3_p = prepared

    x = img.reshape(batch_size, d_in).astype(jnp.bfloat16)
    if m_pad != batch_size or k_pad != d_in:
        # Zero rows/cols contribute nothing to the dots; skipped when aligned.
        x = jnp.zeros((m_pad, k_pad), jnp.bfloat16).at[:batch_size, :d_in].set(x)

    flops = 2 * m_pad * (k_pad * H1 + H1 * H2 + H2 * N_OUT_PAD)
    bytes_accessed = (m_pad * k_pad * 2            # x (bf16)
                      + num_m * k_pad * H1 * 2     # w1 streamed once per M tile
                      + H1 * H2 * 2 + H2 * N_OUT_PAD * 2
                      + (H1 + H2 + N_OUT_PAD) * 4
                      + m_pad * N_OUT_PAD * 2)     # bf16 output
    cost = pl.CostEstimate(flops=flops, transcendentals=m_pad * N_OUT_PAD,
                           bytes_accessed=bytes_accessed)

    if num_k == 1:
        grid = (num_m,)
        kernel = _disc_kernel_single_k
        x_spec = pl.BlockSpec((tm, k_pad), lambda i: (i, 0))
        w1_spec = pl.BlockSpec((k_pad, H1), lambda i: (0, 0))
        const = lambda shape: pl.BlockSpec(shape, lambda i: (0, 0))
        out_spec = pl.BlockSpec((tm, N_OUT_PAD), lambda i: (i, 0))
        scratch = []
        semantics = ("parallel",)
    else:
        grid = (num_m, num_k)
        kernel = _disc_kernel_k_tiled
        x_spec = pl.BlockSpec((tm, tk), lambda i, k: (i, k))
        w1_spec = pl.BlockSpec((tk, H1), lambda i, k: (k, 0))
        const = lambda shape: pl.BlockSpec(shape, lambda i, k: (0, 0))
        out_spec = pl.BlockSpec((tm, N_OUT_PAD), lambda i, k: (i, 0))
        scratch = [pltpu.VMEM((tm, H1), jnp.float32)]     # layer-1 accumulator
        semantics = ("parallel", "arbitrary")

    out = pl.pallas_call(
        kernel,
        out_shape=jax.ShapeDtypeStruct((m_pad, N_OUT_PAD), jnp.bfloat16),
        grid_spec=pltpu.PrefetchScalarGridSpec(
            num_scalar_prefetch=0,
            grid=grid,
            in_specs=[
                x_spec,                       # x  (M[,K] tiled)
                w1_spec,                      # w1 (single block or K-streamed)
                const((1, H1)),               # b1 (resident)
                const((H1, H2)),              # w2 (resident)
                const((1, H2)),               # b2 (resident)
                const((H2, N_OUT_PAD)),       # w3 (resident, lane-padded)
                const((1, N_OUT_PAD)),        # b3 (resident, lane-padded)
            ],
            out_specs=out_spec,
            scratch_shapes=scratch,
        ),
        compiler_params=pltpu.CompilerParams(
            dimension_semantics=semantics,
            # Footprint is a few MiB; never request the full 64 MiB of v7x VMEM.
            vmem_limit_bytes=32 * 1024 * 1024,
        ),
        cost_estimate=cost,
    )(x, w1_p, b1_f, w2_b, b2_f, w3_p, b3_p)

    # Strip batch and lane padding; restore f32 output.
    return out[:batch_size, :1].astype(jnp.float32)


def init_params(key, d_in):
    """Init mimicking torch.nn.Linear default: U(-1/sqrt(fan_in), 1/sqrt(fan_in)).
    Weights stored as (in_features, out_features); biases as (1, out_features)."""
    dims = [(d_in, H1), (H1, H2), (H2, 1)]
    params = []
    for i, (fi, fo) in enumerate(dims):
        kw, kb = jax.random.split(jax.random.fold_in(key, i))
        bound = 1.0 / (fi ** 0.5)
        w = jax.random.uniform(kw, (fi, fo), jnp.float32, -bound, bound)
        b = jax.random.uniform(kb, (1, fo), jnp.float32, -bound, bound)
        params += [w, b]
    return tuple(params)


def _reference_forward(img, params, batch_size, img_shape):
    """Pure-JAX f32 reference matching the PyTorch forward."""
    d_in = img_shape[2] ** 3
    x = img.reshape(batch_size, d_in).astype(jnp.float32)
    w1, b1, w2, b2, w3, b3 = params
    h = x @ w1 + b1
    h = jnp.where(h > 0, h, 0.2 * h)
    h = h @ w2 + b2
    h = jnp.where(h > 0, h, 0.2 * h)
    h = h @ w3 + b3
    return jax.nn.sigmoid(h)


if __name__ == "__main__":
    key = jax.random.PRNGKey(0)

    # --- Case 1: the spec's shape (W=8 -> d_in=512): single-K fast path, tiny batch.
    batch_size = 2
    img_shape = (1, 8, 8)
    W = img_shape[2]
    k_img, k_par = jax.random.split(jax.random.fold_in(key, 0))
    img = jax.random.normal(k_img, (batch_size, W, W, W), dtype=jnp.float32)
    params = init_params(k_par, W ** 3)
    prepared = prepare_params(params, W ** 3)

    validity = jax.block_until_ready(
        discriminator_forward(img, prepared, batch_size, img_shape))
    assert validity.shape == (batch_size, 1)
    assert bool(jnp.all((validity >= 0.0) & (validity <= 1.0)))
    ref = _reference_forward(img, params, batch_size, img_shape)
    # bf16 MXU inputs with f32 accumulation -> documented tolerance vs f32 reference.
    assert bool(jnp.allclose(validity, ref, atol=3e-2)), (validity, ref)

    # --- Case 2: larger d_in / batch: exercises the K-tiled kernel + multi-M grid.
    batch_size2 = 130
    img_shape2 = (1, 20, 20)            # W=20 -> d_in=8000 (> SINGLE_K_MAX)
    W2 = img_shape2[2]
    k_img2, k_par2 = jax.random.split(jax.random.fold_in(key, 1))
    img2 = jax.random.normal(k_img2, (batch_size2, W2, W2, W2), dtype=jnp.float32)
    params2 = init_params(k_par2, W2 ** 3)
    prepared2 = prepare_params(params2, W2 ** 3)

    validity2 = jax.block_until_ready(
        discriminator_forward(img2, prepared2, batch_size2, img_shape2))
    assert validity2.shape == (batch_size2, 1)
    ref2 = _reference_forward(img2, params2, batch_size2, img_shape2)
    assert bool(jnp.allclose(validity2, ref2, atol=3e-2)), float(
        jnp.max(jnp.abs(validity2 - ref2)))

    print("KERNEL_OK")
</pallas_src>

<mosaic_0001>
module attributes {stable_mosaic.version = 11 : i64} {
  func.func @_disc_kernel_single_k(%arg0: i32, %arg1: memref<16x512xbf16, #tpu.memory_space<vmem>>, %arg2: memref<512x512xbf16, #tpu.memory_space<vmem>>, %arg3: memref<1x512xf32, #tpu.memory_space<vmem>>, %arg4: memref<512x256xbf16, #tpu.memory_space<vmem>>, %arg5: memref<1x256xf32, #tpu.memory_space<vmem>>, %arg6: memref<256x128xbf16, #tpu.memory_space<vmem>>, %arg7: memref<1x128xf32, #tpu.memory_space<vmem>>, %arg8: memref<16x128xbf16, #tpu.memory_space<vmem>>) attributes {dimension_semantics = [#tpu.dimension_semantics<parallel>], iteration_bounds = array<i64: 1>, scalar_prefetch = 0 : i64, scratch_operands = 0 : i64, tpu.core_type = #tpu.core_type<tc>, window_params = [{transform_indices = @transform_0, window_bounds = array<i64: 16, 512>}, {pipeline_mode = #tpu.pipeline_mode<synchronous>, transform_indices = @transform_1, window_bounds = array<i64: 512, 512>}, {pipeline_mode = #tpu.pipeline_mode<synchronous>, transform_indices = @transform_2, window_bounds = array<i64: 1, 512>}, {pipeline_mode = #tpu.pipeline_mode<synchronous>, transform_indices = @transform_3, window_bounds = array<i64: 512, 256>}, {pipeline_mode = #tpu.pipeline_mode<synchronous>, transform_indices = @transform_4, window_bounds = array<i64: 1, 256>}, {pipeline_mode = #tpu.pipeline_mode<synchronous>, transform_indices = @transform_5, window_bounds = array<i64: 256, 128>}, {pipeline_mode = #tpu.pipeline_mode<synchronous>, transform_indices = @transform_6, window_bounds = array<i64: 1, 128>}, {transform_indices = @transform_7, window_bounds = array<i64: 16, 128>}]} {
    %c0 = arith.constant 0 : index
    %c0_0 = arith.constant 0 : index
    %0 = vector.load %arg1[%c0, %c0_0] : memref<16x512xbf16, #tpu.memory_space<vmem>>, vector<16x512xbf16>
    %c0_1 = arith.constant 0 : index
    %c0_2 = arith.constant 0 : index
    %1 = vector.load %arg2[%c0_1, %c0_2] : memref<512x512xbf16, #tpu.memory_space<vmem>>, vector<512x512xbf16>
    %cst = arith.constant dense<0.000000e+00> : vector<16x512xf32>
    %2 = tpu.matmul %0, %1, %cst {dimension_numbers = #tpu.dot_dimension_numbers<[1], [0], [0], [1], [0, 0, 1, 1], [], []>} : vector<16x512xbf16>, vector<512x512xbf16>, vector<16x512xf32> -> vector<16x512xf32>
    %c0_3 = arith.constant 0 : index
    %c0_4 = arith.constant 0 : index
    %3 = vector.load %arg3[%c0_3, %c0_4] : memref<1x512xf32, #tpu.memory_space<vmem>>, vector<1x512xf32>
    %4 = vector.broadcast %3 : vector<1x512xf32> to vector<16x512xf32>
    %5 = arith.addf %2, %4 : vector<16x512xf32>
    %cst_5 = arith.constant 0.000000e+00 : f32
    %6 = vector.broadcast %cst_5 : f32 to vector<16x512xf32>
    %7 = arith.cmpf ogt, %5, %6 : vector<16x512xf32>
    %cst_6 = arith.constant 2.000000e-01 : f32
    %8 = vector.broadcast %cst_6 : f32 to vector<16x512xf32>
    %9 = arith.mulf %8, %5 : vector<16x512xf32>
    %10 = arith.select %7, %5, %9 : vector<16x512xi1>, vector<16x512xf32>
    %11 = arith.truncf %10 : vector<16x512xf32> to vector<16x512xbf16>
    %c0_7 = arith.constant 0 : index
    %c0_8 = arith.constant 0 : index
    %12 = vector.load %arg4[%c0_7, %c0_8] : memref<512x256xbf16, #tpu.memory_space<vmem>>, vector<512x256xbf16>
    %cst_9 = arith.constant dense<0.000000e+00> : vector<16x256xf32>
    %13 = tpu.matmul %11, %12, %cst_9 {dimension_numbers = #tpu.dot_dimension_numbers<[1], [0], [0], [1], [0, 0, 1, 1], [], []>} : vector<16x512xbf16>, vector<512x256xbf16>, vector<16x256xf32> -> vector<16x256xf32>
    %c0_10 = arith.constant 0 : index
    %c0_11 = arith.constant 0 : index
    %14 = vector.load %arg5[%c0_10, %c0_11] : memref<1x256xf32, #tpu.memory_space<vmem>>, vector<1x256xf32>
    %15 = vector.broadcast %14 : vector<1x256xf32> to vector<16x256xf32>
    %16 = arith.addf %13, %15 : vector<16x256xf32>
    %cst_12 = arith.constant 0.000000e+00 : f32
    %17 = vector.broadcast %cst_12 : f32 to vector<16x256xf32>
    %18 = arith.cmpf ogt, %16, %17 : vector<16x256xf32>
    %cst_13 = arith.constant 2.000000e-01 : f32
    %19 = vector.broadcast %cst_13 : f32 to vector<16x256xf32>
    %20 = arith.mulf %19, %16 : vector<16x256xf32>
    %21 = arith.select %18, %16, %20 : vector<16x256xi1>, vector<16x256xf32>
    %22 = arith.truncf %21 : vector<16x256xf32> to vector<16x256xbf16>
    %c0_14 = arith.constant 0 : index
    %c0_15 = arith.constant 0 : index
    %23 = vector.load %arg6[%c0_14, %c0_15] : memref<256x128xbf16, #tpu.memory_space<vmem>>, vector<256x128xbf16>
    %cst_16 = arith.constant dense<0.000000e+00> : vector<16x128xf32>
    %24 = tpu.matmul %22, %23, %cst_16 {dimension_numbers = #tpu.dot_dimension_numbers<[1], [0], [0], [1], [0, 0, 1, 1], [], []>} : vector<16x256xbf16>, vector<256x128xbf16>, vector<16x128xf32> -> vector<16x128xf32>
    %c0_17 = arith.constant 0 : index
    %c0_18 = arith.constant 0 : index
    %25 = vector.load %arg7[%c0_17, %c0_18] : memref<1x128xf32, #tpu.memory_space<vmem>>, vector<1x128xf32>
    %26 = vector.broadcast %25 : vector<1x128xf32> to vector<16x128xf32>
    %27 = arith.addf %24, %26 : vector<16x128xf32>
    %28 = arith.negf %27 : vector<16x128xf32>
    %29 = math.exp %28 : vector<16x128xf32>
    %cst_19 = arith.constant 1.000000e+00 : f32
    %30 = vector.broadcast %cst_19 : f32 to vector<16x128xf32>
    %31 = arith.addf %30, %29 : vector<16x128xf32>
    %32 = arith.divf %30, %31 : vector<16x128xf32>
    %33 = arith.truncf %32 : vector<16x128xf32> to vector<16x128xbf16>
    %c0_20 = arith.constant 0 : index
    %c0_21 = arith.constant 0 : index
    %34 = vector.load %arg8[%c0_20, %c0_21] : memref<16x128xbf16, #tpu.memory_space<vmem>>, vector<16x128xbf16>
    tpu.vector_store %arg8[%c0_20, %c0_21], %33 {strides = array<i32>} : memref<16x128xbf16, #tpu.memory_space<vmem>>, vector<16x128xbf16>,
    return
  }
  func.func @transform_0(%arg0: i32) -> (i32, i32) {
    %c0_i32 = arith.constant 0 : i32
    %c0_i32_0 = arith.constant 0 : i32
    return %arg0, %c0_i32 : i32, i32
  }
  func.func @transform_1(%arg0: i32) -> (i32, i32) {
    %c0_i32 = arith.constant 0 : i32
    %c0_i32_0 = arith.constant 0 : i32
    %c0_i32_1 = arith.constant 0 : i32
    return %c0_i32, %c0_i32_0 : i32, i32
  }
  func.func @transform_2(%arg0: i32) -> (i32, i32) {
    %c0_i32 = arith.constant 0 : i32
    %c0_i32_0 = arith.constant 0 : i32
    %c0_i32_1 = arith.constant 0 : i32
    return %c0_i32, %c0_i32_0 : i32, i32
  }
  func.func @transform_3(%arg0: i32) -> (i32, i32) {
    %c0_i32 = arith.constant 0 : i32
    %c0_i32_0 = arith.constant 0 : i32
    %c0_i32_1 = arith.constant 0 : i32
    return %c0_i32, %c0_i32_0 : i32, i32
  }
  func.func @transform_4(%arg0: i32) -> (i32, i32) {
    %c0_i32 = arith.constant 0 : i32
    %c0_i32_0 = arith.constant 0 : i32
    %c0_i32_1 = arith.constant 0 : i32
    return %c0_i32, %c0_i32_0 : i32, i32
  }
  func.func @transform_5(%arg0: i32) -> (i32, i32) {
    %c0_i32 = arith.constant 0 : i32
    %c0_i32_0 = arith.constant 0 : i32
    %c0_i32_1 = arith.constant 0 : i32
    return %c0_i32, %c0_i32_0 : i32, i32
  }
  func.func @transform_6(%arg0: i32) -> (i32, i32) {
    %c0_i32 = arith.constant 0 : i32
    %c0_i32_0 = arith.constant 0 : i32
    %c0_i32_1 = arith.constant 0 : i32
    return %c0_i32, %c0_i32_0 : i32, i32
  }
  func.func @transform_7(%arg0: i32) -> (i32, i32) {
    %c0_i32 = arith.constant 0 : i32
    %c0_i32_0 = arith.constant 0 : i32
    return %arg0, %c0_i32 : i32, i32
  }
}

</mosaic_0001>

<bundles_post_ra>
// kernel: tpu_custom_call.1
= control target key start
LH: loop header
LB: loop body
LE: loop exit
PB: predicated region body
PF: predicated region fallthrough
CT: control target
= control target key end

     0   :  { %12 = vsyncpa [#allocation3], 0  ;;  %s2692_s0 = inlined_call_operand.hbm [shape: bf16[16,512], index: 0, kind: input, shape index: {}]   ;;  %s2693_s1 = inlined_call_operand.hbm [shape: bf16[512,512], index: 1, kind: input, shape index: {}]   ;;  %s2694_s2 = inlined_call_operand.vmem [shape: f32[1,512], index: 2, kind: input, shape index: {}]   ;;  %s2695_s3 = inlined_call_operand.hbm [shape: bf16[512,256], index: 3, kind: input, shape index: {}]   ;;  %s2696_s4 = inlined_call_operand.vmem [shape: f32[1,256], index: 4, kind: input, shape index: {}]   ;;  %s2697_s5 = inlined_call_operand.hbm [shape: bf16[256,128], index: 5, kind: input, shape index: {}]   ;;  %s2698_s6 = inlined_call_operand.vmem [shape: f32[1,128], index: 6, kind: input, shape index: {}]   ;;  %s2699_s7 = inlined_call_operand.hbm [shape: bf16[16,128], index: 7, kind: output, shape index: {}]  }
   0x1   :  { %13 = vsyncpa [#allocation6], 0 }
   0x2   :  { %14 = vsyncpa [#allocation9], 0 }
   0x3   :  { %15 = vsyncpa [#allocation4], 0  ;;  %s2527_s24 = smov [#allocation5]   ;;  %s2528_s26 = smov [#allocation2]  }
   0x4   :  { %s33_s25 = sshll.u32 %s2527_s24, 4  ;;  %s21_s27 = sshll.u32 %s2528_s26, 4  ;;  %s34_s25 = int_to_ptr.vmem [resolvable:$true] %s33_s25  ;;  %s2578_s27 = int_to_ptr.vmem [resolvable:$true] %s21_s27 }
   0x5   :  { %s2409_s30 = scalar_lea.hbm %s2693_s1, 16384 }
   0x6   :  { %p2410_p0 = scmp.ne.s32.totalorder %s2693_s1, %s2409_s30  ;;  %p2413_p1 = scmp.lt.u32.totalorder %s2409_s30, %s2693_s1 }
   0x8   :  { %p2415_p2 = pnand %p2413_p1, %p2410_p0 }
   0xa   :  { %2418 = shalt.err (!%p2415_p2)
}
   0xb   :  { %s2419_s12 = scalar_lea.vmem %s34_s25, 16384  ;;  %p2424_p4 = scmp.lt.s32.totalorder %s34_s25, %s34_s25 }
   0xc   :  { %p2420_p3 = scmp.ne.s32.totalorder %s34_s25, %s2419_s12  ;;  %p2425_p5 = scmp.lt.s32.totalorder %s2419_s12, %s2419_s12 }
   0xe   :  { %p2426_p6 = por %p2425_p5, %p2424_p4 }
  0x10   :  { %p2427_p7 = pnand %p2426_p6, %p2420_p3 }
  0x12   :  { %2430 = shalt.err (!%p2427_p7)
}
  0x13   :  { %s2529_s13 = smov 256   ;;  %s2530_s14 = smov 16  }
  0x14   :  { %39 = dma.hbm_to_vmem [thread:$0]  %s2693_s1, 16384, %s34_s25, [#allocation6], %s2529_s13, %s2529_s13, %s2530_s14  }
  0x15   :  { %s2431_s19 = scalar_lea.hbm %s2692_s0, 512 }
  0x16   :  { %p2432_p8 = scmp.ne.s32.totalorder %s2692_s0, %s2431_s19  ;;  %p2435_p9 = scmp.lt.u32.totalorder %s2431_s19, %s2692_s0 }
  0x18   :  { %p2437_p10 = pnand %p2435_p9, %p2432_p8 }
  0x1a   :  { %2440 = shalt.err (!%p2437_p10)
}
  0x1b   :  { %s2441_s24 = scalar_lea.vmem %s2578_s27, 512  ;;  %p2446_p12 = scmp.lt.s32.totalorder %s2578_s27, %s2578_s27 }
  0x1c   :  { %p2442_p11 = scmp.ne.s32.totalorder %s2578_s27, %s2441_s24  ;;  %p2447_p13 = scmp.lt.s32.totalorder %s2441_s24, %s2441_s24 }
  0x1e   :  { %p2448_p0 = por %p2447_p13, %p2446_p12 }
  0x20   :  { %p2449_p1 = pnand %p2448_p0, %p2442_p11 }
  0x22   :  { %2452 = shalt.err (!%p2449_p1)
}
  0x23   :  { %27 = dma.hbm_to_vmem [thread:$0]  %s2692_s0, 512, %s2578_s27, [#allocation3], %s2529_s13, %s2529_s13, %s2530_s14  }
  0x24   :  { %s2531_s26 = smov [#allocation7]   ;;  %s2453_s8 = scalar_lea.hbm %s2695_s3, 8192 }
  0x25   :  { %s47_s28 = sshll.u32 %s2531_s26, 4  ;;  %p2454_p2 = scmp.ne.s32.totalorder %s2695_s3, %s2453_s8  ;;  %s48_s28 = int_to_ptr.vmem [resolvable:$true] %s47_s28 }
  0x26   :  { %p2457_p3 = scmp.lt.u32.totalorder %s2453_s8, %s2695_s3 }
  0x28   :  { %p2459_p4 = pnand %p2457_p3, %p2454_p2 }
  0x2a   :  { %2462 = shalt.err (!%p2459_p4)
}
  0x2b   :  { %s2463_s15 = scalar_lea.vmem %s48_s28, 8192  ;;  %p2468_p6 = scmp.lt.s32.totalorder %s48_s28, %s48_s28 }
  0x2c   :  { %p2464_p5 = scmp.ne.s32.totalorder %s48_s28, %s2463_s15  ;;  %p2469_p7 = scmp.lt.s32.totalorder %s2463_s15, %s2463_s15 }
  0x2e   :  { %p2470_p8 = por %p2469_p7, %p2468_p6 }
  0x30   :  { %p2471_p9 = pnand %p2470_p8, %p2464_p5 }
  0x32   :  { %2474 = shalt.err (!%p2471_p9)
}
  0x33   :  { %s2532_s0 = smov 128   ;;  %s2533_s27 = smov 8  }
  0x34   :  { %53 = dma.hbm_to_vmem [thread:$0]  %s2695_s3, 8192, %s48_s28, [#allocation6], %s2532_s0, %s2532_s0, %s2533_s27  }
  0x35   :  { %s2534_s16 = smov [#allocation8]   ;;  %s2475_s20 = scalar_lea.hbm %s2697_s5, 2048 }
  0x36   :  { %s61_s17 = sshll.u32 %s2534_s16, 4  ;;  %p2476_p10 = scmp.ne.s32.totalorder %s2697_s5, %s2475_s20  ;;  %s62_s17 = int_to_ptr.vmem [resolvable:$true] %s61_s17 }
  0x37   :  { %p2479_p11 = scmp.lt.u32.totalorder %s2475_s20, %s2697_s5 }
  0x39   :  { %p2481_p12 = pnand %p2479_p11, %p2476_p10 }
  0x3b   :  { %2484 = shalt.err (!%p2481_p12)
}
  0x3c   :  { %s2485_s1 = scalar_lea.vmem %s62_s17, 2048  ;;  %p2490_p0 = scmp.lt.s32.totalorder %s62_s17, %s62_s17 }
  0x3d   :  { %p2486_p13 = scmp.ne.s32.totalorder %s62_s17, %s2485_s1  ;;  %p2491_p1 = scmp.lt.s32.totalorder %s2485_s1, %s2485_s1 }
  0x3f   :  { %p2492_p2 = por %p2491_p1, %p2490_p0 }
  0x41   :  { %p2493_p3 = pnand %p2492_p2, %p2486_p13 }
  0x43   :  { %2496 = shalt.err (!%p2493_p3)
}
  0x44   :  { %s2535_s3 = smov 64   ;;  %s2536_s25 = smov 4  }
  0x45   :  { %67 = dma.hbm_to_vmem [thread:$0]  %s2697_s5, 2048, %s62_s17, [#allocation9], %s2535_s3, %s2535_s3, %s2536_s25  }
  0x46   :  { %2519 = dma.done.wait [#allocation3], 512  }
  0x47   :  { %2520 = vsyncadd [#allocation3], 4294966784 }
  0x48   :  { %2521 = dma.done.wait [#allocation6], 24576  }
  0x49   :  { %2522 = vsyncadd [#allocation6], 4294942720 }
  0x4a   :  { %2523 = dma.done.wait [#allocation9], 2048  }
  0x4b   :  { %2524 = vsyncadd [#allocation9], 4294965248  ;;  %v2091_v0 = vld [vmem:[#allocation5 + $0x4] ss:$16 sps:$4 sm:$0xff]   ;;  %v2093_v1 = vld [vmem:[#allocation5] ss:$16 sps:$4 sm:$0xff]  }
  0x4c   :  { %897 = vmatprep.subr.bf16.mxu1 %v2091_v0  ;;  %v2094_v2 = vld [vmem:[#allocation5 + $0x204] ss:$16 sps:$4 sm:$0xff]   ;;  %v2096_v3 = vld [vmem:[#allocation5 + $0x200] ss:$16 sps:$4 sm:$0xff]   ;;  %v2636_v51 = vld [vmem:[#allocation2 + $0xc] ss:$16 sps:$4 sm:$0xff]  }
  0x4d   :  { %898 = vmatpush1.bf16.msra.mxu1 %v2093_v1  ;;  %v2097_v4 = vld [vmem:[#allocation5 + $0x24] ss:$16 sps:$4 sm:$0xff]   ;;  %v2099_v5 = vld [vmem:[#allocation5 + $0x20] ss:$16 sps:$4 sm:$0xff]   ;;  %940 = vmatprep.subr.bf16.mxu0 %v2094_v2  ;;  %v2192_v1 = vld [vmem:[#allocation5 + $0xc] ss:$16 sps:$4 sm:$0xff]  }
  0x4e   :  { %v2100_v6 = vld [vmem:[#allocation5 + $0x224] ss:$16 sps:$4 sm:$0xff]   ;;  %941 = vmatpush1.bf16.msra.mxu0 %v2096_v3  ;;  %899 = vmatprep.subr.bf16.mxu1 %v2097_v4  ;;  %v2102_v7 = vld [vmem:[#allocation5 + $0x220] ss:$16 sps:$4 sm:$0xff]   ;;  %v2190_v4 = vld [vmem:[#allocation5 + $0x8] ss:$16 sps:$4 sm:$0xff]  }
  0x4f   :  { %942 = vmatprep.subr.bf16.mxu0 %v2100_v6  ;;  %v2103_v8 = vld [vmem:[#allocation5 + $0x44] ss:$16 sps:$4 sm:$0xff]   ;;  %v2105_v9 = vld [vmem:[#allocation5 + $0x40] ss:$16 sps:$4 sm:$0xff]   ;;  %972 = vmatprep.mubr.bf16.mxu0 %v2636_v51  ;;  %v2198_v6 = vld [vmem:[#allocation5 + $0x2c] ss:$16 sps:$4 sm:$0xff]  }
  0x50   :  { %v2106_v10 = vld [vmem:[#allocation5 + $0x244] ss:$16 sps:$4 sm:$0xff]   ;;  %v2108_v12 = vld [vmem:[#allocation5 + $0x240] ss:$16 sps:$4 sm:$0xff]   ;;  %s2537_s9 = smov [#allocation10]  }
  0x51   :  { %900 = vmatpush1.bf16.msra.mxu1 %v2099_v5  ;;  %v2109_v11 = vld [vmem:[#allocation5 + $0x64] ss:$16 sps:$4 sm:$0xff]   ;;  %v2111_v14 = vld [vmem:[#allocation5 + $0x60] ss:$16 sps:$4 sm:$0xff]   ;;  %v2641_v5 = vld [vmem:[#allocation2 + $0x8] ss:$16 sps:$4 sm:$0xff]  }
  0x52   :  { %901 = vmatprep.subr.bf16.mxu1 %v2103_v8  ;;  %943 = vmatpush1.bf16.msra.mxu0 %v2102_v7  ;;  %v2112_v13 = vld [vmem:[#allocation5 + $0x264] ss:$16 sps:$4 sm:$0xff]   ;;  %v2114_v16 = vld [vmem:[#allocation5 + $0x260] ss:$16 sps:$4 sm:$0xff]   ;;  %v2196_v7 = vld [vmem:[#allocation5 + $0x28] ss:$16 sps:$4 sm:$0xff]  }
  0x53   :  { %944 = vmatprep.subr.bf16.mxu0 %v2106_v10  ;;  %v2115_v15 = vld [vmem:[#allocation5 + $0x84] ss:$16 sps:$4 sm:$0xff]   ;;  %v2117_v18 = vld [vmem:[#allocation5 + $0x80] ss:$16 sps:$4 sm:$0xff]   ;;  %v2201_v8 = vld [vmem:[#allocation5 + $0x4c] ss:$16 sps:$4 sm:$0xff]  }
  0x54   :  { %v2118_v17 = vld [vmem:[#allocation5 + $0x284] ss:$16 sps:$4 sm:$0xff]   ;;  %v2120_v20 = vld [vmem:[#allocation5 + $0x280] ss:$16 sps:$4 sm:$0xff]   ;;  %v2204_v10 = vld [vmem:[#allocation5 + $0x6c] ss:$16 sps:$4 sm:$0xff]  }
  0x55   :  { %902 = vmatpush1.bf16.msra.mxu1 %v2105_v9  ;;  %v2121_v19 = vld [vmem:[#allocation5 + $0xa4] ss:$16 sps:$4 sm:$0xff]   ;;  %v2123_v22 = vld [vmem:[#allocation5 + $0xa0] ss:$16 sps:$4 sm:$0xff]   ;;  %v2199_v9 = vld [vmem:[#allocation5 + $0x48] ss:$16 sps:$4 sm:$0xff]  }
  0x56   :  { %903 = vmatprep.subr.bf16.mxu1 %v2109_v11  ;;  %945 = vmatpush1.bf16.msra.mxu0 %v2108_v12  ;;  %v2124_v21 = vld [vmem:[#allocation5 + $0x2a4] ss:$16 sps:$4 sm:$0xff]   ;;  %v2126_v24 = vld [vmem:[#allocation5 + $0x2a0] ss:$16 sps:$4 sm:$0xff]   ;;  %v2202_v11 = vld [vmem:[#allocation5 + $0x68] ss:$16 sps:$4 sm:$0xff]  }
  0x57   :  { %946 = vmatprep.subr.bf16.mxu0 %v2112_v13  ;;  %v2127_v23 = vld [vmem:[#allocation5 + $0xc4] ss:$16 sps:$4 sm:$0xff]   ;;  %v2129_v26 = vld [vmem:[#allocation5 + $0xc0] ss:$16 sps:$4 sm:$0xff]   ;;  %v2207_v12 = vld [vmem:[#allocation5 + $0x8c] ss:$16 sps:$4 sm:$0xff]  }
  0x58   :  { %v2130_v25 = vld [vmem:[#allocation5 + $0x2c4] ss:$16 sps:$4 sm:$0xff]   ;;  %v2132_v28 = vld [vmem:[#allocation5 + $0x2c0] ss:$16 sps:$4 sm:$0xff]   ;;  %v2205_v13 = vld [vmem:[#allocation5 + $0x88] ss:$16 sps:$4 sm:$0xff]  }
  0x59   :  { %904 = vmatpush1.bf16.msra.mxu1 %v2111_v14  ;;  %v2133_v27 = vld [vmem:[#allocation5 + $0xe4] ss:$16 sps:$4 sm:$0xff]   ;;  %v2135_v30 = vld [vmem:[#allocation5 + $0xe0] ss:$16 sps:$4 sm:$0xff]   ;;  %v2210_v14 = vld [vmem:[#allocation5 + $0xac] ss:$16 sps:$4 sm:$0xff]  }
  0x5a   :  { %905 = vmatprep.subr.bf16.mxu1 %v2115_v15  ;;  %947 = vmatpush1.bf16.msra.mxu0 %v2114_v16  ;;  %v2136_v29 = vld [vmem:[#allocation5 + $0x2e4] ss:$16 sps:$4 sm:$0xff]   ;;  %v2138_v32 = vld [vmem:[#allocation5 + $0x2e0] ss:$16 sps:$4 sm:$0xff]   ;;  %v2208_v15 = vld [vmem:[#allocation5 + $0xa8] ss:$16 sps:$4 sm:$0xff]  }
  0x5b   :  { %948 = vmatprep.subr.bf16.mxu0 %v2118_v17  ;;  %v2139_v31 = vld [vmem:[#allocation5 + $0x104] ss:$16 sps:$4 sm:$0xff]   ;;  %v2141_v34 = vld [vmem:[#allocation5 + $0x100] ss:$16 sps:$4 sm:$0xff]   ;;  %v2213_v16 = vld [vmem:[#allocation5 + $0xcc] ss:$16 sps:$4 sm:$0xff]  }
  0x5c   :  { %v2142_v33 = vld [vmem:[#allocation5 + $0x304] ss:$16 sps:$4 sm:$0xff]   ;;  %v2144_v36 = vld [vmem:[#allocation5 + $0x300] ss:$16 sps:$4 sm:$0xff]   ;;  %v2211_v17 = vld [vmem:[#allocation5 + $0xc8] ss:$16 sps:$4 sm:$0xff]  }
  0x5d   :  { %906 = vmatpush1.bf16.msra.mxu1 %v2117_v18  ;;  %v2145_v35 = vld [vmem:[#allocation5 + $0x124] ss:$16 sps:$4 sm:$0xff]   ;;  %v2147_v38 = vld [vmem:[#allocation5 + $0x120] ss:$16 sps:$4 sm:$0xff]   ;;  %v2216_v18 = vld [vmem:[#allocation5 + $0xec] ss:$16 sps:$4 sm:$0xff]  }
  0x5e   :  { %907 = vmatprep.subr.bf16.mxu1 %v2121_v19  ;;  %949 = vmatpush1.bf16.msra.mxu0 %v2120_v20  ;;  %v2148_v37 = vld [vmem:[#allocation5 + $0x324] ss:$16 sps:$4 sm:$0xff]   ;;  %v2150_v40 = vld [vmem:[#allocation5 + $0x320] ss:$16 sps:$4 sm:$0xff]   ;;  %s1796_s10 = sshll.u32 %s2537_s9, 4  ;;  %s1797_s10 = int_to_ptr.vmem [resolvable:$true] %s1796_s10 }
  0x5f   :  { %950 = vmatprep.subr.bf16.mxu0 %v2124_v21  ;;  %v2151_v39 = vld [vmem:[#allocation5 + $0x144] ss:$16 sps:$4 sm:$0xff]   ;;  %v2153_v42 = vld [vmem:[#allocation5 + $0x140] ss:$16 sps:$4 sm:$0xff]   ;;  %p2502_p5 = scmp.lt.s32.totalorder %s1797_s10, %s1797_s10 }
  0x60   :  { %v2154_v41 = vld [vmem:[#allocation5 + $0x344] ss:$16 sps:$4 sm:$0xff]   ;;  %v2156_v44 = vld [vmem:[#allocation5 + $0x340] ss:$16 sps:$4 sm:$0xff]  }
  0x61   :  { %908 = vmatpush1.bf16.msra.mxu1 %v2123_v22  ;;  %v2157_v43 = vld [vmem:[#allocation5 + $0x164] ss:$16 sps:$4 sm:$0xff]   ;;  %v2159_v46 = vld [vmem:[#allocation5 + $0x160] ss:$16 sps:$4 sm:$0xff]   ;;  %v2214_v22 = vld [vmem:[#allocation5 + $0xe8] ss:$16 sps:$4 sm:$0xff]  }
  0x62   :  { %909 = vmatprep.subr.bf16.mxu1 %v2127_v23  ;;  %951 = vmatpush1.bf16.msra.mxu0 %v2126_v24  ;;  %v2160_v45 = vld [vmem:[#allocation5 + $0x364] ss:$16 sps:$4 sm:$0xff]   ;;  %v2162_v49 = vld [vmem:[#allocation5 + $0x360] ss:$16 sps:$4 sm:$0xff]   ;;  %v2219_v23 = vld [vmem:[#allocation5 + $0x10c] ss:$16 sps:$4 sm:$0xff]  }
  0x63   :  { %952 = vmatprep.subr.bf16.mxu0 %v2130_v25  ;;  %v2188_v47 = vld [vmem:[#allocation2 + $0x4] ss:$16 sps:$4 sm:$0xff]   ;;  %v2165_v52 = vld [vmem:[#allocation5 + $0x180] ss:$16 sps:$4 sm:$0xff]  }
  0x64   :  { %v2163_v48 = vld [vmem:[#allocation5 + $0x184] ss:$16 sps:$4 sm:$0xff]   ;;  %929 = vmatprep.mubr.bf16.mxu1 %v2188_v47  ;;  %v2168_v54 = vld [vmem:[#allocation5 + $0x380] ss:$16 sps:$4 sm:$0xff]  }
  0x65   :  { %910 = vmatpush1.bf16.msra.mxu1 %v2129_v26  ;;  %v2166_v50 = vld [vmem:[#allocation5 + $0x384] ss:$16 sps:$4 sm:$0xff]   ;;  %v2171_v56 = vld [vmem:[#allocation5 + $0x1a0] ss:$16 sps:$4 sm:$0xff]   ;;  %v2217_v26 = vld [vmem:[#allocation5 + $0x108] ss:$16 sps:$4 sm:$0xff]  }
  0x66   :  { %911 = vmatprep.subr.bf16.mxu1 %v2133_v27  ;;  %953 = vmatpush1.bf16.msra.mxu0 %v2132_v28  ;;  %v2169_v53 = vld [vmem:[#allocation5 + $0x1a4] ss:$16 sps:$4 sm:$0xff]   ;;  %v2174_v58 = vld [vmem:[#allocation5 + $0x3a0] ss:$16 sps:$4 sm:$0xff]   ;;  %v2222_v27 = vld [vmem:[#allocation5 + $0x12c] ss:$16 sps:$4 sm:$0xff]  }
  0x67   :  { %954 = vmatprep.subr.bf16.mxu0 %v2136_v29  ;;  %v2172_v55 = vld [vmem:[#allocation5 + $0x3a4] ss:$16 sps:$4 sm:$0xff]   ;;  %v2177_v60 = vld [vmem:[#allocation5 + $0x1c0] ss:$16 sps:$4 sm:$0xff]  }
  0x68   :  { %v2175_v57 = vld [vmem:[#allocation5 + $0x1c4] ss:$16 sps:$4 sm:$0xff]   ;;  %v2180_v62 = vld [vmem:[#allocation5 + $0x3c0] ss:$16 sps:$4 sm:$0xff]  }
  0x69   :  { %912 = vmatpush1.bf16.msra.mxu1 %v2135_v30  ;;  %v2178_v59 = vld [vmem:[#allocation5 + $0x3c4] ss:$16 sps:$4 sm:$0xff]   ;;  %v2183_v0 = vld [vmem:[#allocation5 + $0x1e0] ss:$16 sps:$4 sm:$0xff]   ;;  %v2220_v30 = vld [vmem:[#allocation5 + $0x128] ss:$16 sps:$4 sm:$0xff]  }
  0x6a   :  { %913 = vmatprep.subr.bf16.mxu1 %v2139_v31  ;;  %955 = vmatpush1.bf16.msra.mxu0 %v2138_v32  ;;  %v2181_v61 = vld [vmem:[#allocation5 + $0x1e4] ss:$16 sps:$4 sm:$0xff]   ;;  %v2189_v2 = vld [vmem:[#allocation5 + $0x3e0] ss:$16 sps:$4 sm:$0xff]   ;;  %v2225_v31 = vld [vmem:[#allocation5 + $0x14c] ss:$16 sps:$4 sm:$0xff]  }
  0x6b   :  { %956 = vmatprep.subr.bf16.mxu0 %v2142_v33  ;;  %v2184_v63 = vld [vmem:[#allocation5 + $0x3e4] ss:$16 sps:$4 sm:$0xff]   ;;  %v2639_v3 = vld [vmem:[#allocation2] ss:$16 sps:$4 sm:$0xff]  }
  0x6c   :  { %v2289_v19 = vld [vmem:[#allocation7] ss:$8 sps:$4 sm:$0xff]   ;;  %v2291_v20 = vld [vmem:[#allocation7 + $0x4] ss:$8 sps:$4 sm:$0xff]   ;;  %v2294_v21 = vld [vmem:[#allocation7 + $0x14] ss:$8 sps:$4 sm:$0xff]  }
  0x6d   :  { %914 = vmatpush1.bf16.msra.mxu1 %v2141_v34  ;;  %v2292_v24 = vld [vmem:[#allocation7 + $0x10] ss:$8 sps:$4 sm:$0xff]   ;;  %v2297_v25 = vld [vmem:[#allocation7 + $0x24] ss:$8 sps:$4 sm:$0xff]   ;;  %v2295_v28 = vld [vmem:[#allocation7 + $0x20] ss:$8 sps:$4 sm:$0xff]  }
  0x6e   :  { %915 = vmatprep.subr.bf16.mxu1 %v2145_v35  ;;  %957 = vmatpush1.bf16.msra.mxu0 %v2144_v36  ;;  %v2300_v29 = vld [vmem:[#allocation7 + $0x34] ss:$8 sps:$4 sm:$0xff]   ;;  %v2298_v32 = vld [vmem:[#allocation7 + $0x30] ss:$8 sps:$4 sm:$0xff]   ;;  %v2303_v33 = vld [vmem:[#allocation7 + $0x44] ss:$8 sps:$4 sm:$0xff]  }
  0x6f   :  { %958 = vmatprep.subr.bf16.mxu0 %v2148_v37  ;;  %v2223_v34 = vld [vmem:[#allocation5 + $0x148] ss:$16 sps:$4 sm:$0xff]   ;;  %v2228_v35 = vld [vmem:[#allocation5 + $0x16c] ss:$16 sps:$4 sm:$0xff]  }
  0x70   :  { %v2301_v36 = vld [vmem:[#allocation7 + $0x40] ss:$8 sps:$4 sm:$0xff]  }
  0x71   :  { %916 = vmatpush1.bf16.msra.mxu1 %v2147_v38  ;;  %v2226_v37 = vld [vmem:[#allocation5 + $0x168] ss:$16 sps:$4 sm:$0xff]   ;;  %v2306_v38 = vld [vmem:[#allocation7 + $0x54] ss:$8 sps:$4 sm:$0xff]  }
  0x72   :  { %917 = vmatprep.subr.bf16.mxu1 %v2151_v39  ;;  %959 = vmatpush1.bf16.msra.mxu0 %v2150_v40  ;;  %v2231_v39 = vld [vmem:[#allocation5 + $0x18c] ss:$16 sps:$4 sm:$0xff]   ;;  %v2304_v40 = vld [vmem:[#allocation7 + $0x50] ss:$8 sps:$4 sm:$0xff]  }
  0x73   :  { %960 = vmatprep.subr.bf16.mxu0 %v2154_v41  ;;  %v2309_v41 = vld [vmem:[#allocation7 + $0x64] ss:$8 sps:$4 sm:$0xff]  }
  0x75   :  { %918 = vmatpush1.bf16.msra.mxu1 %v2153_v42  ;;  %v2229_v42 = vld [vmem:[#allocation5 + $0x188] ss:$16 sps:$4 sm:$0xff]  }
  0x76   :  { %919 = vmatprep.subr.bf16.mxu1 %v2157_v43  ;;  %961 = vmatpush1.bf16.msra.mxu0 %v2156_v44  ;;  %v2234_v43 = vld [vmem:[#allocation5 + $0x1ac] ss:$16 sps:$4 sm:$0xff]   ;;  %v2307_v44 = vld [vmem:[#allocation7 + $0x60] ss:$8 sps:$4 sm:$0xff]  }
  0x77   :  { %962 = vmatprep.subr.bf16.mxu0 %v2160_v45  ;;  %v2312_v45 = vld [vmem:[#allocation7 + $0x74] ss:$8 sps:$4 sm:$0xff]  }
  0x79   :  { %920 = vmatpush1.bf16.msra.mxu1 %v2159_v46  ;;  %v2232_v46 = vld [vmem:[#allocation5 + $0x1a8] ss:$16 sps:$4 sm:$0xff]  }
  0x7a   :  { %921 = vmatprep.subr.bf16.mxu1 %v2163_v48  ;;  %963 = vmatpush1.bf16.msra.mxu0 %v2162_v49  ;;  %v2310_v48 = vld [vmem:[#allocation7 + $0x70] ss:$8 sps:$4 sm:$0xff]   ;;  %v2315_v49 = vld [vmem:[#allocation7 + $0x84] ss:$8 sps:$4 sm:$0xff]  }
  0x7b   :  { %964 = vmatprep.subr.bf16.mxu0 %v2166_v50  ;;  %v2235_v50 = vld [vmem:[#allocation5 + $0x1c8] ss:$16 sps:$4 sm:$0xff]  }
  0x7d   :  { %922 = vmatpush1.bf16.msra.mxu1 %v2165_v52  ;;  %v2240_v52 = vld [vmem:[#allocation5 + $0x1ec] ss:$16 sps:$4 sm:$0xff]  }
  0x7e   :  { %923 = vmatprep.subr.bf16.mxu1 %v2169_v53  ;;  %965 = vmatpush1.bf16.msra.mxu0 %v2168_v54  ;;  %v2313_v53 = vld [vmem:[#allocation7 + $0x80] ss:$8 sps:$4 sm:$0xff]   ;;  %v2318_v54 = vld [vmem:[#allocation7 + $0x94] ss:$8 sps:$4 sm:$0xff]  }
  0x7f   :  { %966 = vmatprep.subr.bf16.mxu0 %v2172_v55  ;;  %v2238_v55 = vld [vmem:[#allocation5 + $0x1e8] ss:$16 sps:$4 sm:$0xff]  }
  0x81   :  { %924 = vmatpush1.bf16.msra.mxu1 %v2171_v56  ;;  %v2243_v56 = vld [vmem:[#allocation5 + $0x20c] ss:$16 sps:$4 sm:$0xff]  }
  0x82   :  { %925 = vmatprep.subr.bf16.mxu1 %v2175_v57  ;;  %967 = vmatpush1.bf16.msra.mxu0 %v2174_v58  ;;  %v2316_v57 = vld [vmem:[#allocation7 + $0x90] ss:$8 sps:$4 sm:$0xff]   ;;  %v2321_v58 = vld [vmem:[#allocation7 + $0xa4] ss:$8 sps:$4 sm:$0xff]  }
  0x83   :  { %968 = vmatprep.subr.bf16.mxu0 %v2178_v59  ;;  %v2241_v59 = vld [vmem:[#allocation5 + $0x208] ss:$16 sps:$4 sm:$0xff]  }
  0x85   :  { %926 = vmatpush1.bf16.msra.mxu1 %v2177_v60  ;;  %v2246_v60 = vld [vmem:[#allocation5 + $0x22c] ss:$16 sps:$4 sm:$0xff]  }
  0x86   :  { %927 = vmatprep.subr.bf16.mxu1 %v2181_v61  ;;  %969 = vmatpush1.bf16.msra.mxu0 %v2180_v62  ;;  %v2319_v61 = vld [vmem:[#allocation7 + $0xa0] ss:$8 sps:$4 sm:$0xff]   ;;  %v2324_v62 = vld [vmem:[#allocation7 + $0xb4] ss:$8 sps:$4 sm:$0xff]  }
  0x87   :  { %970 = vmatprep.subr.bf16.mxu0 %v2184_v63  ;;  %v2244_v63 = vld [vmem:[#allocation5 + $0x228] ss:$16 sps:$4 sm:$0xff]  }
  0x89   :  { %928 = vmatpush1.bf16.msra.mxu1 %v2183_v0  ;;  %v2249_v0 = vld [vmem:[#allocation5 + $0x24c] ss:$16 sps:$4 sm:$0xff]  }
  0x8a   :  { %983 = vmatprep.subr.bf16.mxu1 %v2192_v1  ;;  %971 = vmatpush1.bf16.msra.mxu0 %v2189_v2  ;;  %v2322_v1 = vld [vmem:[#allocation7 + $0xb0] ss:$8 sps:$4 sm:$0xff]   ;;  %v2327_v2 = vld [vmem:[#allocation7 + $0xc4] ss:$8 sps:$4 sm:$0xff]  }
  0x8b   :  { %1493 = vmatprep.subr.bf16.mxu0 %v2291_v20  ;;  %v2336_v20 = vld [vmem:[#allocation7 + $0xf4] ss:$8 sps:$4 sm:$0xff]  }
  0x8c   :  { %930 = vmatmul.mubr.bf16.vlgmr.msra.gmra.mrb[0].mxu1 %v2639_v3 }
  0x8d   :  { %984 = vmatpush1.bf16.msra.mxu1 %v2190_v4  ;;  %1015 = vmatprep.mubr.bf16.mxu1 %v2188_v47  ;;  %v2237_v47 = vld [vmem:[#allocation5 + $0x1cc] ss:$16 sps:$4 sm:$0xff]   ;;  %v2247_v4 = vld [vmem:[#allocation5 + $0x248] ss:$16 sps:$4 sm:$0xff]  }
  0x8e   :  { %973 = vmatmul.mubr.bf16.vlgmr.msra.gmra.mrb[0].mxu0 %v2641_v5  ;;  %985 = vmatprep.subr.bf16.mxu1 %v2198_v6  ;;  %v2252_v6 = vld [vmem:[#allocation5 + $0x26c] ss:$16 sps:$4 sm:$0xff]  }
  0x8f   :  { %1494 = vmatpush1.bf16.msra.mxu0 %v2289_v19  ;;  %v2267_v19 = vld [vmem:[#allocation5 + $0x30c] ss:$16 sps:$4 sm:$0xff]  }
  0x90   :  { %1495 = vmatprep.subr.bf16.mxu0 %v2294_v21  ;;  %v2334_v21 = vld [vmem:[#allocation7 + $0xf0] ss:$8 sps:$4 sm:$0xff]  }
  0x91   :  { %986 = vmatpush1.bf16.msra.mxu1 %v2196_v7  ;;  %v2325_v7 = vld [vmem:[#allocation7 + $0xc0] ss:$8 sps:$4 sm:$0xff]  }
  0x92   :  { %987 = vmatprep.subr.bf16.mxu1 %v2201_v8  ;;  %v2250_v8 = vld [vmem:[#allocation5 + $0x268] ss:$16 sps:$4 sm:$0xff]  }
  0x93   :  { %1496 = vmatpush1.bf16.msra.mxu0 %v2292_v24  ;;  %v2268_v24 = vld [vmem:[#allocation5 + $0x328] ss:$16 sps:$4 sm:$0xff]  }
  0x94   :  { %1497 = vmatprep.subr.bf16.mxu0 %v2297_v25  ;;  %v2339_v25 = vld [vmem:[#allocation7 + $0x104] ss:$8 sps:$4 sm:$0xff]  }
  0x95   :  { %988 = vmatpush1.bf16.msra.mxu1 %v2199_v9  ;;  %v2258_v9 = vld [vmem:[#allocation5 + $0x2ac] ss:$16 sps:$4 sm:$0xff]  }
  0x96   :  { %989 = vmatprep.subr.bf16.mxu1 %v2204_v10  ;;  %v2256_v10 = vld [vmem:[#allocation5 + $0x2a8] ss:$16 sps:$4 sm:$0xff]  }
  0x97   :  { %1498 = vmatpush1.bf16.msra.mxu0 %v2295_v28  ;;  %v2276_v28 = vld [vmem:[#allocation5 + $0x36c] ss:$16 sps:$4 sm:$0xff]  }
  0x98   :  { %1499 = vmatprep.subr.bf16.mxu0 %v2300_v29  ;;  %v2274_v29 = vld [vmem:[#allocation5 + $0x368] ss:$16 sps:$4 sm:$0xff]  }
  0x99   :  { %990 = vmatpush1.bf16.msra.mxu1 %v2202_v11  ;;  %v2261_v11 = vld [vmem:[#allocation5 + $0x2cc] ss:$16 sps:$4 sm:$0xff]  }
  0x9a   :  { %991 = vmatprep.subr.bf16.mxu1 %v2207_v12  ;;  %v2330_v12 = vld [vmem:[#allocation7 + $0xd4] ss:$8 sps:$4 sm:$0xff]  }
  0x9b   :  { %1500 = vmatpush1.bf16.msra.mxu0 %v2298_v32  ;;  %v2282_v32 = vld [vmem:[#allocation5 + $0x3ac] ss:$16 sps:$4 sm:$0xff]  }
  0x9c   :  { %1501 = vmatprep.subr.bf16.mxu0 %v2303_v33  ;;  %v2280_v33 = vld [vmem:[#allocation5 + $0x3a8] ss:$16 sps:$4 sm:$0xff]  }
  0x9d   :  { %992 = vmatpush1.bf16.msra.mxu1 %v2205_v13  ;;  %v2328_v13 = vld [vmem:[#allocation7 + $0xd0] ss:$8 sps:$4 sm:$0xff]  }
  0x9e   :  { %993 = vmatprep.subr.bf16.mxu1 %v2210_v14  ;;  %v2259_v14 = vld [vmem:[#allocation5 + $0x2c8] ss:$16 sps:$4 sm:$0xff]  }
  0x9f   :  { %1502 = vmatpush1.bf16.msra.mxu0 %v2301_v36  ;;  %v2288_v36 = vld [vmem:[#allocation5 + $0x3ec] ss:$16 sps:$4 sm:$0xff]  }
  0xa0   :  { %1503 = vmatprep.subr.bf16.mxu0 %v2306_v38  ;;  %v217_v38 = vlaneseq }
  0xa1   :  { %994 = vmatpush1.bf16.msra.mxu1 %v2208_v15  ;;  %v2264_v15 = vld [vmem:[#allocation5 + $0x2ec] ss:$16 sps:$4 sm:$0xff]  }
  0xa2   :  { %995 = vmatprep.subr.bf16.mxu1 %v2213_v16  ;;  %v2333_v16 = vld [vmem:[#allocation7 + $0xe4] ss:$8 sps:$4 sm:$0xff]  }
  0xa3   :  { %1504 = vmatpush1.bf16.msra.mxu0 %v2304_v40 }
  0xa4   :  { %1505 = vmatprep.subr.bf16.mxu0 %v2309_v41  ;;  %v2654_v41 = vld [vmem:[%s2694_s2] sm:$0xf] }
  0xa5   :  { %996 = vmatpush1.bf16.msra.mxu1 %v2211_v17  ;;  %v2331_v17 = vld [vmem:[#allocation7 + $0xe0] ss:$8 sps:$4 sm:$0xff]  }
  0xa6   :  { %997 = vmatprep.subr.bf16.mxu1 %v2216_v18  ;;  %v2262_v18 = vld [vmem:[#allocation5 + $0x2e8] ss:$16 sps:$4 sm:$0xff]  }
  0xa7   :  { %1506 = vmatpush1.bf16.msra.mxu0 %v2307_v44 }
  0xa8   :  { %1507 = vmatprep.subr.bf16.mxu0 %v2312_v45 }
  0xa9   :  { %998 = vmatpush1.bf16.msra.mxu1 %v2214_v22  ;;  %v2265_v22 = vld [vmem:[#allocation5 + $0x308] ss:$16 sps:$4 sm:$0xff]  }
  0xaa   :  { %999 = vmatprep.subr.bf16.mxu1 %v2219_v23  ;;  %v2270_v23 = vld [vmem:[#allocation5 + $0x32c] ss:$16 sps:$4 sm:$0xff]  }
  0xab   :  { %1508 = vmatpush1.bf16.msra.mxu0 %v2310_v48 }
  0xac   :  { %1509 = vmatprep.subr.bf16.mxu0 %v2315_v49 }
  0xad   :  { %1000 = vmatpush1.bf16.msra.mxu1 %v2217_v26  ;;  %v2273_v26 = vld [vmem:[#allocation5 + $0x34c] ss:$16 sps:$4 sm:$0xff]  }
  0xae   :  { %1001 = vmatprep.subr.bf16.mxu1 %v2222_v27  ;;  %v2271_v27 = vld [vmem:[#allocation5 + $0x348] ss:$16 sps:$4 sm:$0xff]  }
  0xaf   :  { %1510 = vmatpush1.bf16.msra.mxu0 %v2313_v53 }
  0xb0   :  { %1511 = vmatprep.subr.bf16.mxu0 %v2318_v54 }
  0xb1   :  { %1002 = vmatpush1.bf16.msra.mxu1 %v2220_v30  ;;  %v2279_v30 = vld [vmem:[#allocation5 + $0x38c] ss:$16 sps:$4 sm:$0xff]  }
  0xb2   :  { %1003 = vmatprep.subr.bf16.mxu1 %v2225_v31  ;;  %v2277_v31 = vld [vmem:[#allocation5 + $0x388] ss:$16 sps:$4 sm:$0xff]  }
  0xb3   :  { %1512 = vmatpush1.bf16.msra.mxu0 %v2316_v57 }
  0xb4   :  { %1513 = vmatprep.subr.bf16.mxu0 %v2321_v58 }
  0xb5   :  { %1004 = vmatpush1.bf16.msra.mxu1 %v2223_v34  ;;  %v2285_v34 = vld [vmem:[#allocation5 + $0x3cc] ss:$16 sps:$4 sm:$0xff]  }
  0xb6   :  { %1005 = vmatprep.subr.bf16.mxu1 %v2228_v35  ;;  %v2283_v35 = vld [vmem:[#allocation5 + $0x3c8] ss:$16 sps:$4 sm:$0xff]  }
  0xb7   :  { %1514 = vmatpush1.bf16.msra.mxu0 %v2319_v61 }
  0xb8   :  { %1515 = vmatprep.subr.bf16.mxu0 %v2324_v62 }
  0xb9   :  { %1006 = vmatpush1.bf16.msra.mxu1 %v2226_v37  ;;  %v2286_v37 = vld [vmem:[#allocation5 + $0x3e8] ss:$16 sps:$4 sm:$0xff]  }
  0xba   :  { %1007 = vmatprep.subr.bf16.mxu1 %v2231_v39  ;;  %v2648_v39 = vshrl.u32 %v217_v38, 7  ;;  %v2372_v38 = vld [vmem:[#allocation7 + $0x1b4] ss:$8 sps:$4 sm:$0xff]  }
  0xbb   :  { %1516 = vmatpush1.bf16.msra.mxu0 %v2322_v1 }
  0xbc   :  { %1517 = vmatprep.subr.bf16.mxu0 %v2327_v2  ;;  %v219_v40 = vsub.s32 0, %v2648_v39 }
  0xbd   :  { %1008 = vmatpush1.bf16.msra.mxu1 %v2229_v42  ;;  %v223_v42 = vsub.s32 1, %v2648_v39 }
  0xbe   :  { %1009 = vmatprep.subr.bf16.mxu1 %v2234_v43  ;;  %v220_v43 = vrot.slane %v2654_v41, %v219_v40 }
  0xbf   :  { %1518 = vmatpush1.bf16.msra.mxu0 %v2325_v7 }
  0xc0   :  { %1519 = vmatprep.subr.bf16.mxu0 %v2330_v12  ;;  %v2340_v12 = vld [vmem:[#allocation7 + $0x110] ss:$8 sps:$4 sm:$0xff]  }
  0xc1   :  { %1010 = vmatpush1.bf16.msra.mxu1 %v2232_v46 }
  0xc2   :  { %1011 = vmatprep.subr.bf16.mxu1 %v2237_v47 }
  0xc3   :  { %1520 = vmatpush1.bf16.msra.mxu0 %v2328_v13  ;;  %v2388_v13 = vld [vmem:[#allocation8 + $0x8] sm:$0xff]  }
  0xc4   :  { %1521 = vmatprep.subr.bf16.mxu0 %v2333_v16  ;;  %v2343_v16 = vld [vmem:[#allocation7 + $0x120] ss:$8 sps:$4 sm:$0xff]  }
  0xc5   :  { %1012 = vmatpush1.bf16.msra.mxu1 %v2235_v50 }
  0xc6   :  { %1013 = vmatprep.subr.bf16.mxu1 %v2240_v52 }
  0xc7   :  { %1522 = vmatpush1.bf16.msra.mxu0 %v2331_v17  ;;  %v2390_v17 = vld [vmem:[#allocation8 + $0x10] sm:$0xff]  }
  0xc8   :  { %1523 = vmatprep.subr.bf16.mxu0 %v2336_v20  ;;  %v2346_v20 = vld [vmem:[#allocation7 + $0x130] ss:$8 sps:$4 sm:$0xff]  }
  0xc9   :  { %1014 = vmatpush1.bf16.msra.mxu1 %v2238_v55 }
  0xca   :  { %1026 = vmatprep.subr.bf16.mxu1 %v2243_v56 }
  0xcb   :  { %1524 = vmatpush1.bf16.msra.mxu0 %v2334_v21  ;;  %v2392_v21 = vld [vmem:[#allocation8 + $0x18] sm:$0xff]  }
  0xcc   :  { %1016 = vmatmul.mubr.bf16.vlgmr.msra.gmra.mrb[4].mxu1 %v2639_v3  ;;  %v2255_v3 = vld [vmem:[#allocation5 + $0x28c] ss:$16 sps:$4 sm:$0xff]   ;;  %1536 = vmatprep.subr.bf16.mxu0 %v2339_v25  ;;  %v2394_v25 = vld [vmem:[#allocation8 + $0x20] sm:$0xff]  }
  0xcd   :  { %1027 = vmatpush1.bf16.msra.mxu1 %v2241_v59  ;;  %1058 = vmatprep.mubr.bf16.mxu1 %v2636_v51  ;;  %v2253_v51 = vld [vmem:[#allocation5 + $0x288] ss:$16 sps:$4 sm:$0xff]  }
  0xce   :  { %1028 = vmatprep.subr.bf16.mxu1 %v2246_v60 }
  0xd1   :  { %1029 = vmatpush1.bf16.msra.mxu1 %v2244_v63 }
  0xd2   :  { %1030 = vmatprep.subr.bf16.mxu1 %v2249_v0 }
  0xd5   :  { %1031 = vmatpush1.bf16.msra.mxu1 %v2247_v4 }
  0xd6   :  { %1032 = vmatprep.subr.bf16.mxu1 %v2252_v6 }
  0xd9   :  { %1033 = vmatpush1.bf16.msra.mxu1 %v2250_v8 }
  0xda   :  { %1034 = vmatprep.subr.bf16.mxu1 %v2255_v3  ;;  %v2337_v3 = vld [vmem:[#allocation7 + $0x100] ss:$8 sps:$4 sm:$0xff]  }
  0xdd   :  { %1035 = vmatpush1.bf16.msra.mxu1 %v2253_v51  ;;  %v2342_v51 = vld [vmem:[#allocation7 + $0x114] ss:$8 sps:$4 sm:$0xff]  }
  0xde   :  { %1036 = vmatprep.subr.bf16.mxu1 %v2258_v9  ;;  %v2385_v9 = vld [vmem:[#allocation8 + $0x40] sm:$0xff]  }
  0xe1   :  { %1037 = vmatpush1.bf16.msra.mxu1 %v2256_v10  ;;  %v2386_v10 = vld [vmem:[#allocation8] sm:$0xff]  }
  0xe2   :  { %1038 = vmatprep.subr.bf16.mxu1 %v2261_v11  ;;  %v2387_v11 = vld [vmem:[#allocation8 + $0x48] sm:$0xff]  }
  0xe5   :  { %1039 = vmatpush1.bf16.msra.mxu1 %v2259_v14  ;;  %v2345_v14 = vld [vmem:[#allocation7 + $0x124] ss:$8 sps:$4 sm:$0xff]  }
  0xe6   :  { %1040 = vmatprep.subr.bf16.mxu1 %v2264_v15  ;;  %v2389_v15 = vld [vmem:[#allocation8 + $0x50] sm:$0xff]  }
  0xe9   :  { %1041 = vmatpush1.bf16.msra.mxu1 %v2262_v18  ;;  %v2348_v18 = vld [vmem:[#allocation7 + $0x134] ss:$8 sps:$4 sm:$0xff]  }
  0xea   :  { %1042 = vmatprep.subr.bf16.mxu1 %v2267_v19  ;;  %v2391_v19 = vld [vmem:[#allocation8 + $0x58] sm:$0xff]  }
  0xed   :  { %1043 = vmatpush1.bf16.msra.mxu1 %v2265_v22  ;;  %v2351_v22 = vld [vmem:[#allocation7 + $0x144] ss:$8 sps:$4 sm:$0xff]  }
  0xee   :  { %1044 = vmatprep.subr.bf16.mxu1 %v2270_v23  ;;  %v2393_v23 = vld [vmem:[#allocation8 + $0x60] sm:$0xff]  }
  0xf1   :  { %1045 = vmatpush1.bf16.msra.mxu1 %v2268_v24  ;;  %v2349_v24 = vld [vmem:[#allocation7 + $0x140] ss:$8 sps:$4 sm:$0xff]  }
  0xf2   :  { %1046 = vmatprep.subr.bf16.mxu1 %v2273_v26  ;;  %v2354_v26 = vld [vmem:[#allocation7 + $0x154] ss:$8 sps:$4 sm:$0xff]  }
  0xf5   :  { %1047 = vmatpush1.bf16.msra.mxu1 %v2271_v27  ;;  %v2352_v27 = vld [vmem:[#allocation7 + $0x150] ss:$8 sps:$4 sm:$0xff]  }
  0xf6   :  { %1048 = vmatprep.subr.bf16.mxu1 %v2276_v28  ;;  %v2357_v28 = vld [vmem:[#allocation7 + $0x164] ss:$8 sps:$4 sm:$0xff]  }
  0xf9   :  { %1049 = vmatpush1.bf16.msra.mxu1 %v2274_v29  ;;  %v2355_v29 = vld [vmem:[#allocation7 + $0x160] ss:$8 sps:$4 sm:$0xff]  }
  0xfa   :  { %1050 = vmatprep.subr.bf16.mxu1 %v2279_v30  ;;  %v2360_v30 = vld [vmem:[#allocation7 + $0x174] ss:$8 sps:$4 sm:$0xff]  }
  0xfd   :  { %1051 = vmatpush1.bf16.msra.mxu1 %v2277_v31  ;;  %v2358_v31 = vld [vmem:[#allocation7 + $0x170] ss:$8 sps:$4 sm:$0xff]  }
  0xfe   :  { %1052 = vmatprep.subr.bf16.mxu1 %v2282_v32  ;;  %v2363_v32 = vld [vmem:[#allocation7 + $0x184] ss:$8 sps:$4 sm:$0xff]  }
 0x101   :  { %1053 = vmatpush1.bf16.msra.mxu1 %v2280_v33  ;;  %v2361_v33 = vld [vmem:[#allocation7 + $0x180] ss:$8 sps:$4 sm:$0xff]  }
 0x102   :  { %1054 = vmatprep.subr.bf16.mxu1 %v2285_v34  ;;  %v2366_v34 = vld [vmem:[#allocation7 + $0x194] ss:$8 sps:$4 sm:$0xff]  }
 0x105   :  { %1055 = vmatpush1.bf16.msra.mxu1 %v2283_v35  ;;  %v2364_v35 = vld [vmem:[#allocation7 + $0x190] ss:$8 sps:$4 sm:$0xff]  }
 0x106   :  { %1056 = vmatprep.subr.bf16.mxu1 %v2288_v36  ;;  %v2369_v36 = vld [vmem:[#allocation7 + $0x1a4] ss:$8 sps:$4 sm:$0xff]  }
 0x109   :  { %1057 = vmatpush1.bf16.msra.mxu1 %v2286_v37  ;;  %v2367_v37 = vld [vmem:[#allocation7 + $0x1a0] ss:$8 sps:$4 sm:$0xff]  }
 0x10a   :  { %2034 = vmatprep.subr.bf16.mxu1 %v2385_v9  ;;  %v2395_v9 = vld [vmem:[#allocation8 + $0x68] sm:$0xff]  }
 0x10c   :  { %1059 = vmatmul.mubr.bf16.vlgmr.msra.gmra.mrb[4].mxu1 %v2641_v5  ;;  %v224_v5 = vrot.slane %v2654_v41, %v223_v42 }
 0x10d   :  { %2035 = vmatpush3.bf16.msra.mxu1 %v2386_v10  ;;  %v2396_v10 = vld [vmem:[#allocation8 + $0x28] sm:$0xff]  }
 0x10e   :  { %2036 = vmatprep.subr.bf16.mxu1 %v2387_v11  ;;  %v2397_v11 = vld [vmem:[#allocation8 + $0x70] sm:$0xff]  }
 0x111   :  { %2037 = vmatpush3.bf16.msra.mxu1 %v2388_v13  ;;  %v2399_v13 = vld [vmem:[#allocation8 + $0x78] sm:$0xff]  }
 0x112   :  { %2038 = vmatprep.subr.bf16.mxu1 %v2389_v15  ;;  %v1161_v15 = vld [vmem:[%s2696_s4] sm:$0x3] }
 0x115   :  { %2039 = vmatpush3.bf16.msra.mxu1 %v2390_v17  ;;  %v1170_v17 = vrot.slane %v1161_v15, %v223_v42 }
 0x116   :  { %2040 = vmatprep.subr.bf16.mxu1 %v2391_v19 }
 0x119   :  { %2041 = vmatpush3.bf16.msra.mxu1 %v2392_v21 }
 0x11a   :  { %2042 = vmatprep.subr.bf16.mxu1 %v2393_v23 }
 0x11d   :  { %2043 = vmatpush3.bf16.msra.mxu1 %v2394_v25 }
 0x11e   :  { %2044 = vmatprep.subr.bf16.mxu1 %v2395_v9 }
 0x121   :  { %2045 = vmatpush3.bf16.msra.mxu1 %v2396_v10 }
 0x122   :  { %2046 = vmatprep.subr.bf16.mxu1 %v2397_v11 }
 0x15f   :  { %v931_v44 = vpop.f32.mrb[0].mxu1 }
 0x160   :  { %v932_v45 = vadd.f32 %v931_v44, %v220_v43  ;;  %v933_v46 = vpop.f32.mrb[1].mxu1  ;;  %v2373_v44 = vld [vmem:[#allocation7 + $0x1c0] ss:$8 sps:$4 sm:$0xff]  }
 0x161   :  { %v934_v47 = vadd.f32 %v933_v46, %v224_v5  ;;  %v935_v48 = vpop.f32.mrb[2].mxu1  ;;  %v974_v49 = vpop.f32.mrb[0].mxu0  ;;  %v2376_v46 = vld [vmem:[#allocation7 + $0x1d0] ss:$8 sps:$4 sm:$0xff]  }
 0x162   :  { %v936_v50 = vadd.f32 %v935_v48, %v220_v43  ;;  %v975_v52 = vadd.f32 %v974_v49, %v932_v45  ;;  %v937_v53 = vpop.f32.mrb[3].mxu1  ;;  %v976_v54 = vpop.f32.mrb[1].mxu0  ;;  %v2370_v43 = vld [vmem:[#allocation7 + $0x1b0] ss:$8 sps:$4 sm:$0xff]   ;;  %v2378_v45 = vld [vmem:[#allocation7 + $0x1d4] ss:$8 sps:$4 sm:$0xff]  }
 0x163   :  { %v938_v55 = vadd.f32 %v937_v53, %v224_v5  ;;  %v977_v56 = vadd.f32 %v976_v54, %v934_v47  ;;  %v978_v57 = vpop.f32.mrb[2].mxu0  ;;  %v2375_v5 = vld [vmem:[#allocation7 + $0x1c4] ss:$8 sps:$4 sm:$0xff]   ;;  %v2379_v48 = vld [vmem:[#allocation7 + $0x1e0] ss:$8 sps:$4 sm:$0xff]   ;;  %v231_v53 = vsub.s32 3, %v2648_v39 }
 0x164   :  { %v1077_v58 = vmul.f32 0.2, %v975_v52  ;;  %v979_v59 = vadd.f32 %v978_v57, %v936_v50  ;;  %v980_v60 = vpop.f32.mrb[3].mxu0  ;;  %vm1069_vm0 = vcmp.gt.f32.partialorder %v975_v52, 0.0  ;;  %v2381_v47 = vld [vmem:[#allocation7 + $0x1e4] ss:$8 sps:$4 sm:$0xff]  }
 0x165   :  { %v1078_v61 = vmul.f32 0.2, %v977_v56  ;;  %v981_v62 = vadd.f32 %v980_v60, %v938_v55  ;;  %vm1070_vm1 = vcmp.gt.f32.partialorder %v977_v56, 0.0  ;;  %v2384_v49 = vld [vmem:[#allocation7 + $0x1f4] ss:$8 sps:$4 sm:$0xff]   ;;  %v232_v55 = vrot.slane %v2654_v41, %v231_v53 }
 0x166   :  { %vm1073_vm2 = vcmp.gt.f32.partialorder %v979_v59, 0.0  ;;  %v1081_v63 = vmul.f32 0.2, %v979_v59  ;;  %v1085_v1 = vsel %vm1069_vm0, %v975_v52, %v1077_v58  ;;  %v2382_v50 = vld [vmem:[#allocation7 + $0x1f0] ss:$8 sps:$4 sm:$0xff]   ;;  %v227_v52 = vsub.s32 2, %v2648_v39 }
 0x167   :  { %vm1074_vm3 = vcmp.gt.f32.partialorder %v981_v62, 0.0  ;;  %v1082_v0 = vmul.f32 0.2, %v981_v62  ;;  %v1086_v6 = vsel %vm1070_vm1, %v977_v56, %v1078_v61 }
 0x168   :  { %v1089_v2 = vsel %vm1073_vm2, %v979_v59, %v1081_v63  ;;  %v228_v54 = vrot.slane %v2654_v41, %v227_v52 }
 0x169   :  { %v1093_v4 = vpack.c.bf16 %v1089_v2, %v1085_v1  ;;  %v1090_v7 = vsel %vm1074_vm3, %v981_v62, %v1082_v0 }
 0x16a   :  { %v1094_v8 = vpack.c.bf16 %v1090_v7, %v1086_v6 }
 0x16c   :  { %1525 = vmatprep.mubr.bf16.mxu0 %v1094_v8 }
 0x16d   :  { %1526 = vmatmul.mubr.bf16.vlgmr.msra.gmra.mrb[4].mxu0 %v1093_v4 }
 0x16e   :  { %1537 = vmatpush1.bf16.msra.mxu0 %v2337_v3 }
 0x16f   :  { %1538 = vmatprep.subr.bf16.mxu0 %v2342_v51 }
 0x172   :  { %1539 = vmatpush1.bf16.msra.mxu0 %v2340_v12  ;;  %v2398_v12 = vld [vmem:[#allocation8 + $0x30] sm:$0xff]  }
 0x173   :  { %1540 = vmatprep.subr.bf16.mxu0 %v2345_v14  ;;  %2047 = vmatpush3.bf16.msra.mxu1 %v2398_v12  ;;  %v2400_v14 = vld [vmem:[#allocation8 + $0x38] sm:$0xff]  }
 0x174   :  { %2048 = vmatprep.subr.bf16.mxu1 %v2399_v13 }
 0x176   :  { %1541 = vmatpush1.bf16.msra.mxu0 %v2343_v16  ;;  %v1166_v16 = vrot.slane %v1161_v15, %v219_v40 }
 0x177   :  { %1542 = vmatprep.subr.bf16.mxu0 %v2348_v18  ;;  %2049 = vmatpush3.bf16.msra.mxu1 %v2400_v14 }
 0x17a   :  { %1543 = vmatpush1.bf16.msra.mxu0 %v2346_v20 }
 0x17b   :  { %1544 = vmatprep.subr.bf16.mxu0 %v2351_v22 }
 0x17e   :  { %1545 = vmatpush1.bf16.msra.mxu0 %v2349_v24 }
 0x17f   :  { %1546 = vmatprep.subr.bf16.mxu0 %v2354_v26 }
 0x182   :  { %1547 = vmatpush1.bf16.msra.mxu0 %v2352_v27 }
 0x183   :  { %1548 = vmatprep.subr.bf16.mxu0 %v2357_v28 }
 0x186   :  { %1549 = vmatpush1.bf16.msra.mxu0 %v2355_v29 }
 0x187   :  { %1550 = vmatprep.subr.bf16.mxu0 %v2360_v30 }
 0x18a   :  { %1551 = vmatpush1.bf16.msra.mxu0 %v2358_v31 }
 0x18b   :  { %1552 = vmatprep.subr.bf16.mxu0 %v2363_v32 }
 0x18e   :  { %1553 = vmatpush1.bf16.msra.mxu0 %v2361_v33 }
 0x18f   :  { %1554 = vmatprep.subr.bf16.mxu0 %v2366_v34  ;;  %v2006_v34 = vld [vmem:[%s2698_s6] ss:$0 sm:$0xff]  ;;  %s2497_s6 = scalar_lea.vmem %s1797_s10, 128 }
 0x190   :  { %p2498_p4 = scmp.ne.s32.totalorder %s1797_s10, %s2497_s6  ;;  %p2503_p6 = scmp.lt.s32.totalorder %s2497_s6, %s2497_s6 }
 0x192   :  { %1555 = vmatpush1.bf16.msra.mxu0 %v2364_v35  ;;  %p2504_p7 = por %p2503_p6, %p2502_p5 }
 0x193   :  { %1556 = vmatprep.subr.bf16.mxu0 %v2369_v36 }
 0x194   :  { %p2505_p8 = pnand %p2504_p7, %p2498_p4 }
 0x196   :  { %1557 = vmatpush1.bf16.msra.mxu0 %v2367_v37 }
 0x197   :  { %1558 = vmatprep.subr.bf16.mxu0 %v2372_v38 }
 0x19a   :  { %1559 = vmatpush1.bf16.msra.mxu0 %v2370_v43 }
 0x19b   :  { %1560 = vmatprep.subr.bf16.mxu0 %v2375_v5 }
 0x19e   :  { %1561 = vmatpush1.bf16.msra.mxu0 %v2373_v44 }
 0x19f   :  { %1562 = vmatprep.subr.bf16.mxu0 %v2378_v45 }
 0x1a2   :  { %1563 = vmatpush1.bf16.msra.mxu0 %v2376_v46 }
 0x1a3   :  { %1564 = vmatprep.subr.bf16.mxu0 %v2381_v47 }
 0x1a6   :  { %1565 = vmatpush1.bf16.msra.mxu0 %v2379_v48 }
 0x1a7   :  { %1566 = vmatprep.subr.bf16.mxu0 %v2384_v49 }
 0x1aa   :  { %1567 = vmatpush1.bf16.msra.mxu0 %v2382_v50 }
 0x1df   :  { %v1060_v56 = vpop.f32.mrb[4].mxu1 }
 0x1e0   :  { %v2064_v57 = vadd.f32 %v1060_v56, %v228_v54  ;;  %v1062_v58 = vpop.f32.mrb[5].mxu1 }
 0x1e1   :  { %v2065_v59 = vadd.f32 %v1062_v58, %v232_v55  ;;  %v1064_v60 = vpop.f32.mrb[6].mxu1 }
 0x1e2   :  { %v1079_v61 = vmul.f32 0.2, %v2064_v57  ;;  %v2066_v62 = vadd.f32 %v1064_v60, %v228_v54  ;;  %v1066_v63 = vpop.f32.mrb[7].mxu1  ;;  %vm1071_vm4 = vcmp.gt.f32.partialorder %v2064_v57, 0.0 }
 0x1e3   :  { %v1080_v0 = vmul.f32 0.2, %v2065_v59  ;;  %v2067_v1 = vadd.f32 %v1066_v63, %v232_v55  ;;  %vm1072_vm5 = vcmp.gt.f32.partialorder %v2065_v59, 0.0 }
 0x1e4   :  { %vm1075_vm6 = vcmp.gt.f32.partialorder %v2066_v62, 0.0  ;;  %v1083_v2 = vmul.f32 0.2, %v2066_v62  ;;  %v1087_v6 = vsel %vm1071_vm4, %v2064_v57, %v1079_v61 }
 0x1e5   :  { %vm1076_vm7 = vcmp.gt.f32.partialorder %v2067_v1, 0.0  ;;  %v1084_v4 = vmul.f32 0.2, %v2067_v1  ;;  %v1088_v41 = vsel %vm1072_vm5, %v2065_v59, %v1080_v0 }
 0x1e6   :  { %v1091_v7 = vsel %vm1075_vm6, %v2066_v62, %v1083_v2 }
 0x1e7   :  { %v1095_v8 = vpack.c.bf16 %v1091_v7, %v1087_v6  ;;  %v1092_v3 = vsel %vm1076_vm7, %v2067_v1, %v1084_v4 }
 0x1e8   :  { %v1096_v51 = vpack.c.bf16 %v1092_v3, %v1088_v41 }
 0x1ea   :  { %1568 = vmatprep.mubr.bf16.mxu0 %v1096_v51 }
 0x1eb   :  { %1569 = vmatmul.mubr.bf16.vlgmr.msra.gmra.mrb[4].mxu0 %v1095_v8 }
 0x2be   :  { %v1570_v18 = vpop.f32.mrb[4].mxu0 }
 0x2bf   :  { %v2068_v19 = vadd.f32 %v1570_v18, %v1166_v16  ;;  %v1572_v20 = vpop.f32.mrb[5].mxu0 }
 0x2c0   :  { %v2069_v21 = vadd.f32 %v1572_v20, %v1170_v17  ;;  %v1574_v22 = vpop.f32.mrb[6].mxu0 }
 0x2c1   :  { %v1583_v23 = vmul.f32 0.2, %v2068_v19  ;;  %v2070_v24 = vadd.f32 %v1574_v22, %v1166_v16  ;;  %v1576_v25 = vpop.f32.mrb[7].mxu0  ;;  %vm1579_vm8 = vcmp.gt.f32.partialorder %v2068_v19, 0.0 }
 0x2c2   :  { %v1584_v26 = vmul.f32 0.2, %v2069_v21  ;;  %v2071_v27 = vadd.f32 %v1576_v25, %v1170_v17  ;;  %vm1580_vm9 = vcmp.gt.f32.partialorder %v2069_v21, 0.0 }
 0x2c3   :  { %vm1581_vm10 = vcmp.gt.f32.partialorder %v2070_v24, 0.0  ;;  %v1585_v28 = vmul.f32 0.2, %v2070_v24  ;;  %v1587_v40 = vsel %vm1579_vm8, %v2068_v19, %v1583_v23 }
 0x2c4   :  { %vm1582_vm11 = vcmp.gt.f32.partialorder %v2071_v27, 0.0  ;;  %v1586_v29 = vmul.f32 0.2, %v2071_v27  ;;  %v1588_v42 = vsel %vm1580_vm9, %v2069_v21, %v1584_v26 }
 0x2c5   :  { %v1589_v30 = vsel %vm1581_vm10, %v2070_v24, %v1585_v28 }
 0x2c6   :  { %v1591_v39 = vpack.c.bf16 %v1589_v30, %v1587_v40  ;;  %v1590_v31 = vsel %vm1582_vm11, %v2071_v27, %v1586_v29 }
 0x2c7   :  { %v1592_v32 = vpack.c.bf16 %v1590_v31, %v1588_v42 }
 0x2c9   :  { %1760 = vmatprep.mubr.bf16.mxu1 %v1592_v32 }
 0x2ca   :  { %1761 = vmatmul.mubr.bf16.vlgmr.msra.gmra.mrb[8].mxu1 %v1591_v39 }
 0x39d   :  { %v2050_v33 = vpop.f32.mrb[8].mxu1 }
 0x39e   :  { %v2051_v35 = vpop.f32.mrb[9].mxu1 }
 0x39f   :  { %v2052_v36 = vadd.f32 %v2051_v35, %v2050_v33  ;;  %v2053_v37 = vpop.f32.mrb[10].mxu1 }
 0x3a0   :  { %v2054_v38 = vpop.f32.mrb[11].mxu1 }
 0x3a1   :  { %v1763_v43 = vadd.f32 %v2052_v36, %v2006_v34  ;;  %v2055_v5 = vadd.f32 %v2054_v38, %v2053_v37 }
 0x3a3   :  { %v2023_v44 = vmul.f32 -1.442695, %v1763_v43  ;;  %v1766_v45 = vadd.f32 %v2055_v5, %v2006_v34 }
 0x3a5   :  { %2401 = vpow2.f32 %v2023_v44  ;;  %v2024_v46 = vmul.f32 -1.442695, %v1766_v45 }
 0x3a7   :  { %2403 = vpow2.f32 %v2024_v46 }
 0x3af   :  { %v2402_v47 = vpop.eup %2401 }
 0x3b0   :  { %v1775_v48 = vadd.f32 1.0, %v2402_v47 }
 0x3b1   :  { %v2404_v49 = vpop.eup %2403 }
 0x3b2   :  { %v1776_v50 = vadd.f32 1.0, %v2404_v49  ;;  %2405 = vrcp.f32 %v1775_v48 }
 0x3b4   :  { %2407 = vrcp.f32 %v1776_v50 }
 0x3bc   :  { %v2406_v52 = vpop.eup %2405 }
 0x3be   :  { %v2408_v53 = vpop.eup %2407 }
 0x3bf   :  { %v2032_v54 = vpack.c.bf16 %v2408_v53, %v2406_v52 }
 0x3c1   :  { %2033 = vst [vmem:[#allocation10] sm:$0xff] %v2032_v54  }
 0x3c2   :  { %2508 = shalt.err (!%p2505_p8)
}
 0x3c3   :  { %s2509_s15 = scalar_lea.hbm %s2699_s7, 128 }
 0x3c4   :  { %p2510_p9 = scmp.ne.s32.totalorder %s2699_s7, %s2509_s15  ;;  %p2513_p10 = scmp.lt.u32.totalorder %s2509_s15, %s2699_s7 }
 0x3c6   :  { %p2515_p11 = pnand %p2513_p10, %p2510_p9 }
 0x3c8   :  { %2518 = shalt.err (!%p2515_p11)
}
 0x3c9   :  { %1802 = dma.vmem_to_hbm [thread:$0]  %s1797_s10, 128, %s2699_s7, [#allocation4], %s2535_s3, %s2535_s3, %s2536_s25  }
 0x3ca   :  { %2525 = dma.done.wait [#allocation4], 128  }
 0x3cb   :  { %2526 = vsyncadd [#allocation4], 4294967168 }
 0x3cc   :  { %1806 = vsyncpa [#allocation3], 1 }
 0x3cd   :  { %1807 = vsyncpa [#allocation6], 1 }
 0x3ce   :  { %1808 = vsyncpa [#allocation9], 1 }
 0x3cf   :  { %1809 = vsyncpa [#allocation4], 1 }

</bundles_post_ra>
